<compile_context>
chip_gen: v7x
topology: tpu7x:2x2x1
jax: 0.10.0
libtpu: 0.0.40
codegen_flags: <defaults>
</compile_context>

<pallas_src>
import functools

import jax
import jax.numpy as jnp
from jax.experimental import pallas as pl
from jax.experimental.pallas import tpu as pltpu

_HID = 5   # hidden width
_OUT = 2   # output width


def _round_up(n, m):
    return ((n + m - 1) // m) * m


def _test_net_kernel(x_ref, w1_ref, ps_ref, o_ref, acc_ref, *, num_layers):
    i = pl.program_id(0)

    @pl.when(i == 0)
    def _init():
        acc_ref[...] = jnp.zeros_like(acc_ref)

    # First linear layer, one lane-block of the folded N reduction:
    # (5, 8, bn) * (8, bn) -> lane reduce -> (5, 8, 1) partial sums (VPU+XLU).
    part = jnp.sum(w1_ref[...] * x_ref[...], axis=-1, keepdims=True)
    acc_ref[0:_HID, :, :] += part          # rows 5..7 of acc stay zero

    @pl.when(i == pl.num_programs(0) - 1)
    def _finalize():
        # Fold the 8 sublane partials -> (8,1) column (rows 5..7 == 0), then
        # add the first-layer bias (stored as a lane-0 column in slab slot 1).
        h = jnp.sum(acc_ref[...], axis=1) + ps_ref[1][:, 0:1]      # (8, 1)
        h_is_col = True
        # Middle layers + output layer, fully unrolled, all on VPU/XLU.
        # Orientation alternates; the wrapper packed each weight/bias tile to
        # match (Case A: column in -> row out, Case B: row in -> column out).
        for l in range(num_layers + 1):
            w = ps_ref[2 * (1 + l)]        # (8, 128) oriented weight tile
            b = ps_ref[2 * (1 + l) + 1]    # (8, 128) additive bias tile
            if h_is_col:
                h = jnp.sum(w * h + b, axis=0, keepdims=True)      # (1, 128)
            else:
                h = jnp.sum(w * h + b, axis=1, keepdims=True)      # (8, 1)
            h_is_col = not h_is_col
        o_ref[...] = h


def pack_small_params(b1, mid_w, mid_b, w_out, b_out):
    """Pack all tiny params into one (2*(L+2), 8, 128) f32 slab.

    Slot 0: unused.  Slot 1: b1 as a lane-0 column.
    Slots 2*(1+l), 2*(1+l)+1: oriented weight / additive-bias tile for
    combined layer l (l < L: middle layer l; l == L: output layer).
    """
    L = mid_w.shape[0]
    ps = jnp.zeros((2 * (L + 2), 8, 128), jnp.float32)
    ps = ps.at[1, :_HID, 0].set(b1.astype(jnp.float32))
    for l in range(L + 1):
        W = (mid_w[l] if l < L else w_out).astype(jnp.float32)   # (out, in)
        b = (mid_b[l] if l < L else b_out).astype(jnp.float32)   # (out,)
        out_dim, in_dim = W.shape
        wi, bi = 2 * (1 + l), 2 * (1 + l) + 1
        if l % 2 == 0:
            # Case A (column input, row output): store W^T, bias along row 0.
            ps = ps.at[wi, :in_dim, :out_dim].set(W.T)
            ps = ps.at[bi, 0, :out_dim].set(b)
        else:
            # Case B (row input, column output): store W, bias along lane 0.
            ps = ps.at[wi, :out_dim, :in_dim].set(W)
            ps = ps.at[bi, :out_dim, 0].set(b)
    return ps


def test_net_forward(x, params, *, block_n=16384):
    """Pallas implementation of test_net.forward.  Returns a (2,) f32 vector."""
    W1 = params["W1"].astype(jnp.float32)          # (5, N)  PyTorch layout
    L = params["midW"].shape[0]
    N = W1.shape[1]

    x_flat = x.reshape(-1).astype(jnp.float32)
    assert x_flat.shape[0] == N, "flattened input must match input_size"

    # Fold the N reduction onto an (8 sublane, nl lane) grid so the first
    # layer weight is stored fully dense as (5, 8, nl): no sublane padding.
    nl = _round_up(N, 8) // 8
    bn = min(block_n, _round_up(nl, 128))
    nl_pad = _round_up(nl, bn)
    grid_n = nl_pad // bn
    n_pad = 8 * nl_pad

    if n_pad == N:
        x2 = x_flat.reshape(8, nl_pad)
        w1 = W1.reshape(_HID, 8, nl_pad)
    else:
        # Zero-pad so out-of-range positions contribute exactly zero.
        x2 = jnp.zeros((n_pad,), jnp.float32).at[:N].set(x_flat)
        x2 = x2.reshape(8, nl_pad)
        w1 = jnp.zeros((_HID, n_pad), jnp.float32).at[:, :N].set(W1)
        w1 = w1.reshape(_HID, 8, nl_pad)

    ps = pack_small_params(params["b1"], params["midW"], params["midb"],
                           params["Wo"], params["bo"])

    out_is_col = (L % 2 == 1)
    out_shape = (8, 1) if out_is_col else (1, 128)

    kernel = functools.partial(_test_net_kernel, num_layers=L)

    out = pl.pallas_call(
        kernel,
        out_shape=jax.ShapeDtypeStruct(out_shape, jnp.float32),
        grid_spec=pltpu.PrefetchScalarGridSpec(
            num_scalar_prefetch=0,
            grid=(grid_n,),
            in_specs=[
                pl.BlockSpec((8, bn), lambda i: (0, i)),                   # x
                pl.BlockSpec((_HID, 8, bn), lambda i: (0, 0, i)),          # w1
                pl.BlockSpec((2 * (L + 2), 8, 128), lambda i: (0, 0, 0)),  # slab
            ],
            out_specs=pl.BlockSpec(out_shape, lambda i: (0, 0)),
            scratch_shapes=[pltpu.VMEM((8, 8, 1), jnp.float32)],
        ),
        compiler_params=pltpu.CompilerParams(
            dimension_semantics=("arbitrary",)),
    )(x2, w1, ps)

    if out_is_col:
        return out[:_OUT, 0]
    return out[0, :_OUT]


def init_params(key, input_size, num_layers):
    """PyTorch-style uniform(-1/sqrt(fan_in), 1/sqrt(fan_in)) init, PyTorch layouts."""
    ks = jax.random.split(key, 6)

    def u(k, shape, fan_in):
        bound = 1.0 / jnp.sqrt(jnp.float32(fan_in))
        return jax.random.uniform(k, shape, jnp.float32, -bound, bound)

    return {
        "W1": u(ks[0], (_HID, input_size), input_size),     # (5, N)
        "b1": u(ks[1], (_HID,), input_size),
        "midW": u(ks[2], (num_layers, _HID, _HID), _HID),   # (L, 5, 5)
        "midb": u(ks[3], (num_layers, _HID), _HID),
        "Wo": u(ks[4], (_OUT, _HID), _HID),                 # (2, 5)
        "bo": u(ks[5], (_OUT,), _HID),
    }


def reference_forward(x, params):
    """Plain-JAX reference mirroring the PyTorch module exactly."""
    h = x.reshape(-1) @ params["W1"].T + params["b1"]
    for l in range(params["midW"].shape[0]):
        h = h @ params["midW"][l].T + params["midb"][l]
    return h @ params["Wo"].T + params["bo"]


if __name__ == "__main__":
    num_layers = 3
    x_shape = (2, 4, 16)                 # flatten -> 128 == input_size
    input_size = 2 * 4 * 16

    key = jax.random.PRNGKey(0)
    kx, kp = jax.random.split(key)
    x = jax.random.normal(kx, x_shape, jnp.float32)
    params = init_params(kp, input_size, num_layers)

    out = test_net_forward(x, params)
    out = jax.block_until_ready(out)

    ref = reference_forward(x, params)
    assert out.shape == (_OUT,)
    assert jnp.allclose(out, ref, atol=1e-5, rtol=1e-5), (out, ref)

    print("KERNEL_OK")
</pallas_src>

<mosaic_0001>
module attributes {stable_mosaic.version = 11 : i64} {
  func.func @_test_net_kernel(%arg0: i32, %arg1: memref<8x128xf32, #tpu.memory_space<vmem>>, %arg2: memref<5x8x128xf32, #tpu.memory_space<vmem>>, %arg3: memref<10x8x128xf32, #tpu.memory_space<vmem>>, %arg4: memref<8x1xf32, #tpu.memory_space<vmem>>, %arg5: memref<8x8x1xf32, #tpu.memory_space<vmem>>) attributes {dimension_semantics = [#tpu.dimension_semantics<arbitrary>], iteration_bounds = array<i64: 1>, scalar_prefetch = 0 : i64, scratch_operands = 1 : i64, tpu.core_type = #tpu.core_type<tc>, window_params = [{transform_indices = @transform_0, window_bounds = array<i64: 8, 128>}, {transform_indices = @transform_1, window_bounds = array<i64: 5, 8, 128>}, {pipeline_mode = #tpu.pipeline_mode<synchronous>, transform_indices = @transform_2, window_bounds = array<i64: 10, 8, 128>}, {pipeline_mode = #tpu.pipeline_mode<synchronous>, transform_indices = @transform_3, window_bounds = array<i64: 8, 1>}]} {
    %c0_i32 = arith.constant 0 : i32
    %0 = arith.cmpi eq, %arg0, %c0_i32 : i32
    %1 = arith.extui %0 : i1 to i32
    %c0_i32_0 = arith.constant 0 : i32
    %2 = arith.cmpi ne, %1, %c0_i32_0 : i32
    scf.if %2 {
      %cst_13 = arith.constant 0.000000e+00 : f32
      %16 = vector.broadcast %cst_13 : f32 to vector<8x8x1xf32>
      %c0_14 = arith.constant 0 : index
      %c0_15 = arith.constant 0 : index
      %c0_16 = arith.constant 0 : index
      %17 = vector.load %arg5[%c0_14, %c0_15, %c0_16] : memref<8x8x1xf32, #tpu.memory_space<vmem>>, vector<8x8x1xf32>
      tpu.vector_store %arg5[%c0_14, %c0_15, %c0_16], %16 {strides = array<i32>} : memref<8x8x1xf32, #tpu.memory_space<vmem>>, vector<8x8x1xf32>,
    } else {
    }
    %c0 = arith.constant 0 : index
    %c0_1 = arith.constant 0 : index
    %c0_2 = arith.constant 0 : index
    %3 = vector.load %arg2[%c0, %c0_1, %c0_2] : memref<5x8x128xf32, #tpu.memory_space<vmem>>, vector<5x8x128xf32>
    %c0_3 = arith.constant 0 : index
    %c0_4 = arith.constant 0 : index
    %4 = vector.load %arg1[%c0_3, %c0_4] : memref<8x128xf32, #tpu.memory_space<vmem>>, vector<8x128xf32>
    %5 = vector.shape_cast %4 : vector<8x128xf32> to vector<1x8x128xf32>
    %6 = vector.broadcast %5 : vector<1x8x128xf32> to vector<5x8x128xf32>
    %7 = arith.mulf %3, %6 : vector<5x8x128xf32>
    %cst = arith.constant dense<0.000000e+00> : vector<5x8xf32>
    %8 = vector.multi_reduction <add>, %7, %cst [2] : vector<5x8x128xf32> to vector<5x8xf32>
    %9 = vector.shape_cast %8 : vector<5x8xf32> to vector<5x8x1xf32>
    %c0_5 = arith.constant 0 : index
    %c0_6 = arith.constant 0 : index
    %c0_7 = arith.constant 0 : index
    %10 = vector.load %arg5[%c0_5, %c0_6, %c0_7] : memref<8x8x1xf32, #tpu.memory_space<vmem>>, vector<5x8x1xf32>
    %11 = arith.addf %10, %9 : vector<5x8x1xf32>
    %c0_8 = arith.constant 0 : index
    %c0_9 = arith.constant 0 : index
    %c0_10 = arith.constant 0 : index
    %12 = vector.load %arg5[%c0_8, %c0_9, %c0_10] : memref<8x8x1xf32, #tpu.memory_space<vmem>>, vector<5x8x1xf32>
    tpu.vector_store %arg5[%c0_8, %c0_9, %c0_10], %11 {strides = array<i32>} : memref<8x8x1xf32, #tpu.memory_space<vmem>>, vector<5x8x1xf32>,
    %c0_i32_11 = arith.constant 0 : i32
    %13 = arith.cmpi eq, %arg0, %c0_i32_11 : i32
    %14 = arith.extui %13 : i1 to i32
    %c0_i32_12 = arith.constant 0 : i32
    %15 = arith.cmpi ne, %14, %c0_i32_12 : i32
    scf.if %15 {
      %c0_13 = arith.constant 0 : index
      %c0_14 = arith.constant 0 : index
      %c0_15 = arith.constant 0 : index
      %16 = vector.load %arg5[%c0_13, %c0_14, %c0_15] : memref<8x8x1xf32, #tpu.memory_space<vmem>>, vector<8x8x1xf32>
      %cst_16 = arith.constant dense<0.000000e+00> : vector<8x1xf32>
      %17 = vector.multi_reduction <add>, %16, %cst_16 [1] : vector<8x8x1xf32> to vector<8x1xf32>
      %c1 = arith.constant 1 : index
      %c0_17 = arith.constant 0 : index
      %c0_18 = arith.constant 0 : index
      %18 = vector.load %arg3[%c1, %c0_17, %c0_18] : memref<10x8x128xf32, #tpu.memory_space<vmem>>, vector<1x8x128xf32>
      %19 = vector.shape_cast %18 : vector<1x8x128xf32> to vector<8x128xf32>
      %20 = vector.extract_strided_slice %19 {offsets = [0, 0], sizes = [8, 1], strides = [1, 1]} : vector<8x128xf32> to vector<8x1xf32>
      %21 = arith.addf %17, %20 : vector<8x1xf32>
      %c2 = arith.constant 2 : index
      %c0_19 = arith.constant 0 : index
      %c0_20 = arith.constant 0 : index
      %22 = vector.load %arg3[%c2, %c0_19, %c0_20] : memref<10x8x128xf32, #tpu.memory_space<vmem>>, vector<1x8x128xf32>
      %23 = vector.shape_cast %22 : vector<1x8x128xf32> to vector<8x128xf32>
      %c3 = arith.constant 3 : index
      %c0_21 = arith.constant 0 : index
      %c0_22 = arith.constant 0 : index
      %24 = vector.load %arg3[%c3, %c0_21, %c0_22] : memref<10x8x128xf32, #tpu.memory_space<vmem>>, vector<1x8x128xf32>
      %25 = vector.shape_cast %24 : vector<1x8x128xf32> to vector<8x128xf32>
      %26 = vector.broadcast %21 : vector<8x1xf32> to vector<8x128xf32>
      %27 = arith.mulf %23, %26 : vector<8x128xf32>
      %28 = arith.addf %27, %25 : vector<8x128xf32>
      %cst_23 = arith.constant dense<0.000000e+00> : vector<128xf32>
      %29 = vector.multi_reduction <add>, %28, %cst_23 [0] : vector<8x128xf32> to vector<128xf32>
      %30 = vector.shape_cast %29 : vector<128xf32> to vector<1x128xf32>
      %c4 = arith.constant 4 : index
      %c0_24 = arith.constant 0 : index
      %c0_25 = arith.constant 0 : index
      %31 = vector.load %arg3[%c4, %c0_24, %c0_25] : memref<10x8x128xf32, #tpu.memory_space<vmem>>, vector<1x8x128xf32>
      %32 = vector.shape_cast %31 : vector<1x8x128xf32> to vector<8x128xf32>
      %c5 = arith.constant 5 : index
      %c0_26 = arith.constant 0 : index
      %c0_27 = arith.constant 0 : index
      %33 = vector.load %arg3[%c5, %c0_26, %c0_27] : memref<10x8x128xf32, #tpu.memory_space<vmem>>, vector<1x8x128xf32>
      %34 = vector.shape_cast %33 : vector<1x8x128xf32> to vector<8x128xf32>
      %35 = vector.broadcast %30 : vector<1x128xf32> to vector<8x128xf32>
      %36 = arith.mulf %32, %35 : vector<8x128xf32>
      %37 = arith.addf %36, %34 : vector<8x128xf32>
      %cst_28 = arith.constant dense<0.000000e+00> : vector<8xf32>
      %38 = vector.multi_reduction <add>, %37, %cst_28 [1] : vector<8x128xf32> to vector<8xf32>
      %39 = vector.shape_cast %38 : vector<8xf32> to vector<8x1xf32>
      %c6 = arith.constant 6 : index
      %c0_29 = arith.constant 0 : index
      %c0_30 = arith.constant 0 : index
      %40 = vector.load %arg3[%c6, %c0_29, %c0_30] : memref<10x8x128xf32, #tpu.memory_space<vmem>>, vector<1x8x128xf32>
      %41 = vector.shape_cast %40 : vector<1x8x128xf32> to vector<8x128xf32>
      %c7 = arith.constant 7 : index
      %c0_31 = arith.constant 0 : index
      %c0_32 = arith.constant 0 : index
      %42 = vector.load %arg3[%c7, %c0_31, %c0_32] : memref<10x8x128xf32, #tpu.memory_space<vmem>>, vector<1x8x128xf32>
      %43 = vector.shape_cast %42 : vector<1x8x128xf32> to vector<8x128xf32>
      %44 = vector.broadcast %39 : vector<8x1xf32> to vector<8x128xf32>
      %45 = arith.mulf %41, %44 : vector<8x128xf32>
      %46 = arith.addf %45, %43 : vector<8x128xf32>
      %cst_33 = arith.constant dense<0.000000e+00> : vector<128xf32>
      %47 = vector.multi_reduction <add>, %46, %cst_33 [0] : vector<8x128xf32> to vector<128xf32>
      %48 = vector.shape_cast %47 : vector<128xf32> to vector<1x128xf32>
      %c8 = arith.constant 8 : index
      %c0_34 = arith.constant 0 : index
      %c0_35 = arith.constant 0 : index
      %49 = vector.load %arg3[%c8, %c0_34, %c0_35] : memref<10x8x128xf32, #tpu.memory_space<vmem>>, vector<1x8x128xf32>
      %50 = vector.shape_cast %49 : vector<1x8x128xf32> to vector<8x128xf32>
      %c9 = arith.constant 9 : index
      %c0_36 = arith.constant 0 : index
      %c0_37 = arith.constant 0 : index
      %51 = vector.load %arg3[%c9, %c0_36, %c0_37] : memref<10x8x128xf32, #tpu.memory_space<vmem>>, vector<1x8x128xf32>
      %52 = vector.shape_cast %51 : vector<1x8x128xf32> to vector<8x128xf32>
      %53 = vector.broadcast %48 : vector<1x128xf32> to vector<8x128xf32>
      %54 = arith.mulf %50, %53 : vector<8x128xf32>
      %55 = arith.addf %54, %52 : vector<8x128xf32>
      %cst_38 = arith.constant dense<0.000000e+00> : vector<8xf32>
      %56 = vector.multi_reduction <add>, %55, %cst_38 [1] : vector<8x128xf32> to vector<8xf32>
      %57 = vector.shape_cast %56 : vector<8xf32> to vector<8x1xf32>
      %c0_39 = arith.constant 0 : index
      %c0_40 = arith.constant 0 : index
      %58 = vector.load %arg4[%c0_39, %c0_40] : memref<8x1xf32, #tpu.memory_space<vmem>>, vector<8x1xf32>
      tpu.vector_store %arg4[%c0_39, %c0_40], %57 {strides = array<i32>} : memref<8x1xf32, #tpu.memory_space<vmem>>, vector<8x1xf32>,
    } else {
    }
    return
  }
  func.func @transform_0(%arg0: i32) -> (i32, i32) {
    %c0_i32 = arith.constant 0 : i32
    %c0_i32_0 = arith.constant 0 : i32
    return %c0_i32, %arg0 : i32, i32
  }
  func.func @transform_1(%arg0: i32) -> (i32, i32, i32) {
    %c0_i32 = arith.constant 0 : i32
    %c0_i32_0 = arith.constant 0 : i32
    %c0_i32_1 = arith.constant 0 : i32
    return %c0_i32, %c0_i32_0, %arg0 : i32, i32, i32
  }
  func.func @transform_2(%arg0: i32) -> (i32, i32, i32) {
    %c0_i32 = arith.constant 0 : i32
    %c0_i32_0 = arith.constant 0 : i32
    %c0_i32_1 = arith.constant 0 : i32
    %c0_i32_2 = arith.constant 0 : i32
    return %c0_i32, %c0_i32_0, %c0_i32_1 : i32, i32, i32
  }
  func.func @transform_3(%arg0: i32) -> (i32, i32) {
    %c0_i32 = arith.constant 0 : i32
    %c0_i32_0 = arith.constant 0 : i32
    %c0_i32_1 = arith.constant 0 : i32
    return %c0_i32, %c0_i32_0 : i32, i32
  }
}

</mosaic_0001>

<bundles_post_ra>
// kernel: tpu_custom_call.1
= control target key start
LH: loop header
LB: loop body
LE: loop exit
PB: predicated region body
PF: predicated region fallthrough
CT: control target
= control target key end

     0   :  { %8 = vsyncpa [#allocation4], 0  ;;  %s470_s0 = inlined_call_operand.hbm [shape: f32[8,128], index: 0, kind: input, shape index: {}]   ;;  %s471_s1 = inlined_call_operand.hbm [shape: f32[5,8,128], index: 1, kind: input, shape index: {}]   ;;  %s472_s2 = inlined_call_operand.hbm [shape: f32[10,8,128], index: 2, kind: input, shape index: {}]   ;;  %s473_s3 = inlined_call_operand.vmem [shape: f32[8,1], index: 3, kind: output, shape index: {}]  }
   0x1   :  { %9 = vsyncpa [#allocation6], 0  ;;  %s376_s12 = smov [#allocation5]   ;;  %s306_s16 = scalar_lea.hbm %s471_s1, 640 }
   0x2   :  { %s25_s13 = sshll.u32 %s376_s12, 4  ;;  %p307_p0 = scmp.ne.s32.totalorder %s471_s1, %s306_s16  ;;  %s26_s13 = int_to_ptr.vmem [resolvable:$true] %s25_s13 }
   0x3   :  { %p310_p1 = scmp.lt.u32.totalorder %s306_s16, %s471_s1 }
   0x5   :  { %p312_p2 = pnand %p310_p1, %p307_p0 }
   0x7   :  { %315 = shalt.err (!%p312_p2)
}
   0x8   :  { %s316_s21 = scalar_lea.vmem %s26_s13, 640  ;;  %p321_p4 = scmp.lt.s32.totalorder %s26_s13, %s26_s13 }
   0x9   :  { %p317_p3 = scmp.ne.s32.totalorder %s26_s13, %s316_s21  ;;  %p322_p5 = scmp.lt.s32.totalorder %s316_s21, %s316_s21 }
   0xb   :  { %p323_p6 = por %p322_p5, %p321_p4 }
   0xd   :  { %p324_p7 = pnand %p323_p6, %p317_p3 }
   0xf   :  { %327 = shalt.err (!%p324_p7)
}
  0x10   :  { %s377_s22 = smov 128   ;;  %s378_s23 = smov 8  }
  0x11   :  { %31 = dma.hbm_to_vmem [thread:$0]  %s471_s1, 640, %s26_s13, [#allocation6], %s377_s22, %s377_s22, %s378_s23  }
  0x12   :  { %s379_s26 = smov [#allocation3]   ;;  %s380_s28 = smov [#allocation7]  }
  0x13   :  { %s16_s27 = sshll.u32 %s379_s26, 4  ;;  %s37_s29 = sshll.u32 %s380_s28, 4  ;;  %s17_s27 = int_to_ptr.vmem [resolvable:$true] %s16_s27  ;;  %s38_s29 = int_to_ptr.vmem [resolvable:$true] %s37_s29 }
  0x14   :  { %s328_s5 = scalar_lea.hbm %s470_s0, 128 }
  0x15   :  { %p329_p8 = scmp.ne.s32.totalorder %s470_s0, %s328_s5  ;;  %p332_p9 = scmp.lt.u32.totalorder %s328_s5, %s470_s0 }
  0x17   :  { %p334_p10 = pnand %p332_p9, %p329_p8 }
  0x19   :  { %337 = shalt.err (!%p334_p10)
}
  0x1a   :  { %s338_s1 = scalar_lea.vmem %s17_s27, 128  ;;  %p343_p12 = scmp.lt.s32.totalorder %s17_s27, %s17_s27 }
  0x1b   :  { %p339_p11 = scmp.ne.s32.totalorder %s17_s27, %s338_s1  ;;  %p344_p13 = scmp.lt.s32.totalorder %s338_s1, %s338_s1 }
  0x1d   :  { %p345_p0 = por %p344_p13, %p343_p12 }
  0x1f   :  { %p346_p1 = pnand %p345_p0, %p339_p11 }
  0x21   :  { %349 = shalt.err (!%p346_p1)
}
  0x22   :  { %19 = dma.hbm_to_vmem [thread:$0]  %s470_s0, 128, %s17_s27, [#allocation4]  }
  0x23   :  { %s350_s14 = scalar_lea.hbm %s472_s2, 1280 }
  0x24   :  { %p351_p2 = scmp.ne.s32.totalorder %s472_s2, %s350_s14  ;;  %p354_p3 = scmp.lt.u32.totalorder %s350_s14, %s472_s2 }
  0x26   :  { %p356_p4 = pnand %p354_p3, %p351_p2 }
  0x28   :  { %359 = shalt.err (!%p356_p4)
}
  0x29   :  { %s360_s19 = scalar_lea.vmem %s38_s29, 1280  ;;  %p365_p6 = scmp.lt.s32.totalorder %s38_s29, %s38_s29 }
  0x2a   :  { %p361_p5 = scmp.ne.s32.totalorder %s38_s29, %s360_s19  ;;  %p366_p7 = scmp.lt.s32.totalorder %s360_s19, %s360_s19 }
  0x2c   :  { %p367_p8 = por %p366_p7, %p365_p6 }
  0x2e   :  { %p368_p9 = pnand %p367_p8, %p361_p5 }
  0x30   :  { %371 = shalt.err (!%p368_p9)
}
  0x31   :  { %43 = dma.hbm_to_vmem [thread:$0]  %s472_s2, 1280, %s38_s29, [#allocation6], %s377_s22, %s377_s22, %s378_s23  }
  0x32   :  { %372 = dma.done.wait [#allocation4], 128  }
  0x33   :  { %373 = vsyncadd [#allocation4], 4294967168 }
  0x34   :  { %374 = dma.done.wait [#allocation6], 1920  }
  0x35   :  { %375 = vsyncadd [#allocation6], 4294965376  ;;  %vm57_vm0 = vcmask 7168   ;;  %v381_v0 = vmov 0.0   ;;  %v67_v1 = vld [vmem:[#allocation5 + $0x8] sm:$0xff]  ;;  %v71_v2 = vld [vmem:[#allocation3] sm:$0xff] }
  0x36   :  { %59 = vst.msk [vmem:[#allocation2 + $0x8] sm:$0xff] %vm57_vm0, %v381_v0  ;;  %58 = vst.msk [vmem:[#allocation2] sm:$0xff] %vm57_vm0, %v381_v0  ;;  %v66_v3 = vld [vmem:[#allocation5] sm:$0xff]  ;;  %v73_v4 = vmul.f32 %v71_v2, %v67_v1  ;;  %v68_v6 = vld [vmem:[#allocation5 + $0x10] sm:$0xff]  ;;  %v382_v12 = vmov 0   ;;  %vm233_vm1 = vcmask 1041409  }
  0x37   :  { %60 = vst.msk [vmem:[#allocation2 + $0x10] sm:$0xff] %vm57_vm0, %v381_v0  ;;  %61 = vst.msk [vmem:[#allocation2 + $0x18] sm:$0xff] %vm57_vm0, %v381_v0  ;;  %v72_v5 = vmul.f32 %v71_v2, %v66_v3  ;;  %v69_v7 = vld [vmem:[#allocation5 + $0x18] sm:$0xff]  ;;  %v74_v8 = vmul.f32 %v71_v2, %v68_v6  ;;  %v70_v10 = vld [vmem:[#allocation5 + $0x20] sm:$0xff]  ;;  %304 = vset.pattern.permute.xlu1 %v382_v12  ;;  %305 = vset.pattern.permute.xlu0 %v382_v12  ;;  %vm236_vm2 = vcmask 1042434   ;;  %vm239_vm3 = vcmask 1043459  }
  0x38   :  { %62 = vst.msk [vmem:[#allocation2 + $0x20] sm:$0xff] %vm57_vm0, %v381_v0  ;;  %63 = vst.msk [vmem:[#allocation2 + $0x28] sm:$0xff] %vm57_vm0, %v381_v0  ;;  %79 = vadd.xlane.f32.xlu0 %v73_v4  ;;  %v75_v9 = vmul.f32 %v71_v2, %v69_v7  ;;  %v76_v11 = vmul.f32 %v71_v2, %v70_v10  ;;  %v171_v55 = vld [vmem:[#allocation7 + $0x8] sm:$0xff]  ;;  %vm242_vm4 = vcmask 1044484   ;;  %vm245_vm5 = vcmask 1045509  }
  0x39   :  { %64 = vst.msk [vmem:[#allocation2 + $0x30] sm:$0xff] %vm57_vm0, %v381_v0  ;;  %65 = vst.msk [vmem:[#allocation2 + $0x38] sm:$0xff] %vm57_vm0, %v381_v0  ;;  %77 = vadd.xlane.f32.xlu1 %v72_v5  ;;  %v173_v1 = vrot.slane %v171_v55, 1  ;;  %v177_v5 = vrot.slane %v171_v55, 5  ;;  %vm248_vm6 = vcmask 1046534   ;;  %vm251_vm7 = vcmask 1047559  }
  0x3c   :  { %81 = vadd.xlane.f32.xlu0 %v74_v8 }
  0x3d   :  { %83 = vadd.xlane.f32.xlu1 %v75_v9  ;;  %v88_v14 = vld [vmem:[#allocation2 + $0x8] sm:$0xff]  ;;  %v87_v15 = vld [vmem:[#allocation2] sm:$0xff] }
  0x3e   :  { %v89_v23 = vld [vmem:[#allocation2 + $0x10] sm:$0xff]  ;;  %v90_v24 = vld [vmem:[#allocation2 + $0x18] sm:$0xff] }
  0x3f   :  { %v111_v13 = vld [vmem:[#allocation2 + $0x28] sm:$0xff]  ;;  %v91_v31 = vld [vmem:[#allocation2 + $0x20] sm:$0xff] }
  0x40   :  { %85 = vadd.xlane.f32.xlu0 %v76_v11  ;;  %v149_v16 = vsel %vm57_vm0, %v111_v13, 0.0  ;;  %v112_v19 = vld [vmem:[#allocation2 + $0x30] sm:$0xff]  ;;  %v113_v54 = vld [vmem:[#allocation2 + $0x38] sm:$0xff]  ;;  %v174_v11 = vrot.slane %v171_v55, 2 }
  0x41   :  { %v150_v22 = vrot.slane %v149_v16, 4  ;;  %v156_v25 = vsel %vm57_vm0, %v112_v19, 0.0  ;;  %v163_v63 = vsel %vm57_vm0, %v113_v54, 0.0  ;;  %v178_v19 = vrot.slane %v171_v55, 6 }
  0x42   :  { %v157_v32 = vrot.slane %v156_v25, 4  ;;  %v164_v10 = vrot.slane %v163_v63, 4 }
  0x43   :  { %v151_v30 = vadd.f32 %v150_v22, %v149_v16 }
  0x44   :  { %v158_v37 = vadd.f32 %v157_v32, %v156_v25 }
  0x45   :  { %v152_v35 = vrot.slane %v151_v30, 2 }
  0x46   :  { %v159_v45 = vrot.slane %v158_v37, 2 }
  0x47   :  { %v153_v43 = vadd.f32 %v152_v35, %v151_v30 }
  0x48   :  { %v160_v58 = vadd.f32 %v159_v45, %v158_v37 }
  0x49   :  { %v154_v56 = vrot.slane %v153_v43, 1 }
  0x4a   :  { %v161_v8 = vrot.slane %v160_v58, 1 }
  0x4b   :  { %v155_v4 = vadd.f32 %v154_v56, %v153_v43 }
  0xc5   :  { %v80_v17 = vpop.xlane.xlu0 %79 }
  0xc6   :  { %v78_v18 = vpop.xlane.xlu1 %77  ;;  %v93_v20 = vadd.f32 %v88_v14, %v80_v17  ;;  %v193_v17 = vadd.f32 %v177_v5, %v155_v4 }
  0xc7   :  { %v92_v21 = vadd.f32 %v87_v15, %v78_v18  ;;  %v162_v18 = vadd.f32 %v161_v8, %v160_v58 }
  0xc8   :  { %99 = vst.msk [vmem:[#allocation2 + $0x8] sm:$0xff] %vm57_vm0, %v93_v20 }
  0xc9   :  { %98 = vst.msk [vmem:[#allocation2] sm:$0xff] %vm57_vm0, %v92_v21  ;;  %v82_v26 = vpop.xlane.xlu0 %81  ;;  %v165_v21 = vadd.f32 %v164_v10, %v163_v63  ;;  %v197_v63 = vld [vmem:[#allocation7 + $0x10] sm:$0xff] }
  0xca   :  { %v84_v27 = vpop.xlane.xlu1 %83  ;;  %v94_v28 = vadd.f32 %v89_v23, %v82_v26  ;;  %v194_v26 = vadd.f32 %v178_v19, %v162_v18 }
  0xcb   :  { %v95_v29 = vadd.f32 %v90_v24, %v84_v27  ;;  %v166_v27 = vrot.slane %v165_v21, 2 }
  0xcc   :  { %100 = vst.msk [vmem:[#allocation2 + $0x10] sm:$0xff] %vm57_vm0, %v94_v28 }
  0xcd   :  { %101 = vst.msk [vmem:[#allocation2 + $0x18] sm:$0xff] %vm57_vm0, %v95_v29  ;;  %v86_v33 = vpop.xlane.xlu0 %85 }
  0xce   :  { %v96_v34 = vadd.f32 %v91_v31, %v86_v33  ;;  %v167_v31 = vadd.f32 %v166_v27, %v165_v21 }
  0xcf   :  { %v107_v36 = vld [vmem:[#allocation2 + $0x8] sm:$0xff] }
  0xd0   :  { %v106_v38 = vld [vmem:[#allocation2] sm:$0xff]  ;;  %102 = vst.msk [vmem:[#allocation2 + $0x20] sm:$0xff] %vm57_vm0, %v96_v34  ;;  %v121_v39 = vsel %vm57_vm0, %v107_v36, 0.0  ;;  %v175_v34 = vrot.slane %v171_v55, 3  ;;  %v168_v36 = vrot.slane %v167_v31, 1 }
  0xd1   :  { %v114_v40 = vsel %vm57_vm0, %v106_v38, 0.0  ;;  %v122_v41 = vrot.slane %v121_v39, 4 }
  0xd2   :  { %v115_v42 = vrot.slane %v114_v40, 4 }
  0xd3   :  { %v123_v44 = vadd.f32 %v122_v41, %v121_v39  ;;  %v108_v46 = vld [vmem:[#allocation2 + $0x10] sm:$0xff]  ;;  %v176_v39 = vrot.slane %v171_v55, 4  ;;  %v179_v41 = vrot.slane %v171_v55, 7 }
  0xd4   :  { %v109_v47 = vld [vmem:[#allocation2 + $0x18] sm:$0xff]  ;;  %v128_v48 = vsel %vm57_vm0, %v108_v46, 0.0  ;;  %v116_v49 = vadd.f32 %v115_v42, %v114_v40  ;;  %v169_v40 = vadd.f32 %v168_v36, %v167_v31 }
  0xd5   :  { %v135_v50 = vsel %vm57_vm0, %v109_v47, 0.0  ;;  %v124_v51 = vrot.slane %v123_v44, 2  ;;  %v129_v52 = vrot.slane %v128_v48, 4 }
  0xd6   :  { %v136_v53 = vrot.slane %v135_v50, 4  ;;  %v117_v61 = vrot.slane %v116_v49, 2  ;;  %v195_v43 = vadd.f32 %v179_v41, %v169_v40 }
  0xd7   :  { %v125_v57 = vadd.f32 %v124_v51, %v123_v44  ;;  %v130_v59 = vadd.f32 %v129_v52, %v128_v48  ;;  %v110_v60 = vld [vmem:[#allocation2 + $0x20] sm:$0xff] }
  0xd8   :  { %v142_v62 = vsel %vm57_vm0, %v110_v60, 0.0  ;;  %v137_v3 = vadd.f32 %v136_v53, %v135_v50  ;;  %v118_v12 = vadd.f32 %v117_v61, %v116_v49 }
  0xd9   :  { %v126_v0 = vrot.slane %v125_v57, 1  ;;  %v131_v2 = vrot.slane %v130_v59, 2  ;;  %v143_v6 = vrot.slane %v142_v62, 4 }
  0xda   :  { %v138_v15 = vrot.slane %v137_v3, 2  ;;  %v119_v23 = vrot.slane %v118_v12, 1 }
  0xdb   :  { %v127_v7 = vadd.f32 %v126_v0, %v125_v57  ;;  %v132_v9 = vadd.f32 %v131_v2, %v130_v59  ;;  %v144_v16 = vadd.f32 %v143_v6, %v142_v62  ;;  %v199_v2 = vld [vmem:[#allocation7 + $0x18] sm:$0xff] }
  0xdc   :  { %v139_v24 = vadd.f32 %v138_v15, %v137_v3  ;;  %v120_v28 = vadd.f32 %v119_v23, %v118_v12 }
  0xdd   :  { %v189_v13 = vadd.f32 %v173_v1, %v127_v7  ;;  %v133_v14 = vrot.slane %v132_v9, 1  ;;  %v145_v25 = vrot.slane %v144_v16, 2 }
  0xde   :  { %v140_v29 = vrot.slane %v139_v24, 1  ;;  %v188_v32 = vadd.f32 %v171_v55, %v120_v28  ;;  %v285_v28 = vld [vmem:[#allocation7 + $0x48] sm:$0xff] }
  0xdf   :  { %206 = vperm.xlu1 %304, %v189_v13   ;;  %v134_v20 = vadd.f32 %v133_v14, %v132_v9  ;;  %v146_v30 = vadd.f32 %v145_v25, %v144_v16  ;;  %v265_v13 = vld [vmem:[#allocation7 + $0x28] sm:$0xff]  ;;  %v271_v16 = vld [vmem:[#allocation7 + $0x30] sm:$0xff] }
  0xe0   :  { %v141_v33 = vadd.f32 %v140_v29, %v139_v24 }
  0xe1   :  { %v190_v22 = vadd.f32 %v174_v11, %v134_v20  ;;  %v147_v35 = vrot.slane %v146_v30, 1  ;;  %v263_v11 = vld [vmem:[#allocation7 + $0x20] sm:$0xff] }
  0xe2   :  { %v191_v37 = vadd.f32 %v175_v34, %v141_v33 }
  0xe3   :  { %222 = vperm.xlu1 %304, %v193_v17   ;;  %210 = vperm.xlu0 %305, %v190_v22   ;;  %v148_v38 = vadd.f32 %v147_v35, %v146_v30  ;;  %v273_v17 = vld [vmem:[#allocation7 + $0x38] sm:$0xff] }
  0xe5   :  { %v192_v42 = vadd.f32 %v176_v39, %v148_v38 }
  0xe7   :  { %226 = vperm.xlu1 %304, %v194_v26   ;;  %v283_v26 = vld [vmem:[#allocation7 + $0x40] sm:$0xff] }
  0xeb   :  { %202 = vperm.xlu1 %304, %v188_v32  }
  0xef   :  { %214 = vperm.xlu1 %304, %v191_v37  }
  0xf3   :  { %218 = vperm.xlu1 %304, %v192_v42  }
  0xf7   :  { %230 = vperm.xlu1 %304, %v195_v43  }
 0x15e   :  { %v207_v44 = vpop.permute.xlu1 %206 }
 0x15f   :  { %v232_v49 = vrot.slane %v207_v44, 7 }
 0x162   :  { %v223_v45 = vpop.permute.xlu1 %222  ;;  %v211_v48 = vpop.permute.xlu0 %210 }
 0x163   :  { %v235_v51 = vrot.slane %v211_v48, 6  ;;  %v244_v57 = vrot.slane %v223_v45, 3 }
 0x166   :  { %v227_v46 = vpop.permute.xlu1 %226 }
 0x167   :  { %v247_v59 = vrot.slane %v227_v46, 2 }
 0x16a   :  { %v203_v47 = vpop.permute.xlu1 %202 }
 0x16b   :  { %v234_v52 = vsel %vm233_vm1, %v232_v49, %v203_v47 }
 0x16c   :  { %v237_v55 = vsel %vm236_vm2, %v235_v51, %v234_v52 }
 0x16e   :  { %v215_v50 = vpop.permute.xlu1 %214 }
 0x16f   :  { %v238_v53 = vrot.slane %v215_v50, 5 }
 0x171   :  { %v240_v58 = vsel %vm239_vm3, %v238_v53, %v237_v55 }
 0x172   :  { %v219_v54 = vpop.permute.xlu1 %218 }
 0x173   :  { %v241_v56 = vrot.slane %v219_v54, 4 }
 0x175   :  { %v243_v60 = vsel %vm242_vm4, %v241_v56, %v240_v58 }
 0x176   :  { %v246_v61 = vsel %vm245_vm5, %v244_v57, %v243_v60  ;;  %v231_v62 = vpop.permute.xlu1 %230 }
 0x177   :  { %v249_v0 = vsel %vm248_vm6, %v247_v59, %v246_v61  ;;  %v250_v1 = vrot.slane %v231_v62, 1 }
 0x179   :  { %v252_v3 = vsel %vm251_vm7, %v250_v1, %v249_v0 }
 0x17a   :  { %v254_v4 = vmul.f32 %v252_v3, %v197_v63 }
 0x17c   :  { %v255_v5 = vadd.f32 %v254_v4, %v199_v2 }
 0x17e   :  { %v256_v6 = vrot.slane %v255_v5, 4 }
 0x180   :  { %v257_v7 = vadd.f32 %v256_v6, %v255_v5 }
 0x182   :  { %v258_v8 = vrot.slane %v257_v7, 2 }
 0x184   :  { %v259_v9 = vadd.f32 %v258_v8, %v257_v7 }
 0x186   :  { %v260_v10 = vrot.slane %v259_v9, 1 }
 0x188   :  { %v261_v12 = vadd.f32 %v260_v10, %v259_v9 }
 0x18a   :  { %v266_v14 = vmul.f32 %v263_v11, %v261_v12 }
 0x18c   :  { %v267_v15 = vadd.f32 %v266_v14, %v265_v13 }
 0x18e   :  { %268 = vadd.xlane.f32.xlu1 %v267_v15 }
 0x21b   :  { %v269_v18 = vpop.xlane.xlu1 %268 }
 0x21c   :  { %v274_v19 = vmul.f32 %v271_v16, %v269_v18 }
 0x21e   :  { %v275_v20 = vadd.f32 %v274_v19, %v273_v17 }
 0x220   :  { %v276_v21 = vrot.slane %v275_v20, 4 }
 0x222   :  { %v277_v22 = vadd.f32 %v276_v21, %v275_v20 }
 0x224   :  { %v278_v23 = vrot.slane %v277_v22, 2 }
 0x226   :  { %v279_v24 = vadd.f32 %v278_v23, %v277_v22 }
 0x228   :  { %v280_v25 = vrot.slane %v279_v24, 1 }
 0x22a   :  { %v281_v27 = vadd.f32 %v280_v25, %v279_v24 }
 0x22c   :  { %v286_v29 = vmul.f32 %v283_v26, %v281_v27 }
 0x22e   :  { %v287_v30 = vadd.f32 %v286_v29, %v285_v28 }
 0x230   :  { %288 = vadd.xlane.f32.xlu0 %v287_v30 }
 0x2bd   :  { %v289_v31 = vpop.xlane.xlu0 %288 }
 0x2be   :  { %290 = vst.msk [vmem:[%s473_s3] sm:$0xff] %vm57_vm0, %v289_v31 }
 0x2bf   :  { %295 = vsyncpa [#allocation4], 1 }
 0x2c0   :  { %296 = vsyncpa [#allocation6], 1 }

</bundles_post_ra>
